<compile_context>
chip_gen: v7x
topology: tpu7x:2x2x1
jax: 0.10.0
libtpu: 0.0.40
codegen_flags: <defaults>
</compile_context>

<pallas_src>
import jax
import jax.numpy as jnp
from jax.experimental import pallas as pl
from jax.experimental.pallas import tpu as pltpu


def _scale_kernel(scale_ref, x_ref, o_ref):
    # scale_ref: (1, 1) f32 scalar in SMEM; x_ref / o_ref: VMEM tiles.
    # Cast the scalar (not the tile) so the multiply runs in x's dtype.
    s = scale_ref[0, 0].astype(x_ref.dtype)
    o_ref[...] = x_ref[...] * s


_TARGET_BLOCK_BYTES = 2 * 1024 * 1024  # ~2 MiB / block -> ~8 MiB VMEM w/ dbl-buffering


def _choose_tile_rows(rows, cols, itemsize):
    """Full `rows` if one block fits the target size; otherwise the largest
    multiple of 8 within budget, preferring an exact divisor of `rows` so
    every block gets unmasked stores."""
    max_t = max(8, _TARGET_BLOCK_BYTES // max(1, cols * itemsize))
    if rows <= max_t:
        return rows  # full-extent block along rows (always legal)
    t = (max_t // 8) * 8
    for cand in range(t, max(8, t // 2) - 1, -8):
        if rows % cand == 0:
            return cand
    return t  # last block is a masked boundary block


def _scale_2d(x2d, scale, tile_rows):
    rows, cols = x2d.shape
    grid_rows = pl.cdiv(rows, tile_rows)
    scale_arr = jnp.asarray(scale, dtype=jnp.float32).reshape(1, 1)
    return pl.pallas_call(
        _scale_kernel,
        out_shape=jax.ShapeDtypeStruct((rows, cols), x2d.dtype),
        grid_spec=pltpu.PrefetchScalarGridSpec(
            num_scalar_prefetch=0,
            grid=(grid_rows,),
            in_specs=[
                pl.BlockSpec(memory_space=pltpu.SMEM),              # scalar scale
                pl.BlockSpec((tile_rows, cols), lambda i: (i, 0)),  # x tile
            ],
            out_specs=pl.BlockSpec((tile_rows, cols), lambda i: (i, 0)),
        ),
        compiler_params=pltpu.CompilerParams(
            dimension_semantics=("parallel",),  # shard row loop across TCs on v7x
        ),
    )(scale_arr, x2d)


def scale_forward(x, scale):
    """y = x * scale (scale is a single learnable scalar)."""
    orig_shape = x.shape
    n = x.size
    if n == 0:
        return x
    itemsize = jnp.dtype(x.dtype).itemsize

    # Fast path: lane-dense 2-D view, no padding, free reshape.
    for cols in (4096, 2048, 1024, 512, 256, 128):
        if n % cols == 0:
            rows = n // cols
            tile_rows = _choose_tile_rows(rows, cols, itemsize)
            y2d = _scale_2d(x.reshape(rows, cols), scale, tile_rows)
            return y2d.reshape(orig_shape)

    # Ragged size (x.size not a multiple of 128).
    if x.ndim >= 2:
        # Natural (prod(leading), last) view is a free reshape; the boundary
        # block is masked by Pallas.  Lane-partial stores if last dim < 128,
        # but still a single HBM pass (no pad / slice round trips).
        cols = orig_shape[-1]
        rows = n // cols
        tile_rows = _choose_tile_rows(rows, cols, itemsize)
        y2d = _scale_2d(x.reshape(rows, cols), scale, tile_rows)
        return y2d.reshape(orig_shape)

    # 0-D / 1-D ragged input that fits comfortably in one VMEM block.
    if n * itemsize <= 4 * 1024 * 1024:
        y2d = _scale_2d(x.reshape(1, n), scale, 1)
        return y2d.reshape(orig_shape)

    # Very large ragged 1-D input (exceptional): pad the flat tail once.
    # TODO(synk): replace pad/slice with an in-kernel masked 1-D tail if this
    # path ever becomes hot.
    cols = 512
    rows = -(-n // cols)
    rows_p = -(-rows // 8) * 8
    x_flat = jnp.pad(jnp.ravel(x), (0, rows_p * cols - n))
    tile_rows = _choose_tile_rows(rows_p, cols, itemsize)
    y2d = _scale_2d(x_flat.reshape(rows_p, cols), scale, tile_rows)
    return y2d.reshape(-1)[:n].reshape(orig_shape)


class ScaleModule:
    """JAX analogue of mmdet Scale: a single learnable scalar parameter."""

    def __init__(self, scale=1.0):
        # Same init as nn.Parameter(torch.tensor(scale, dtype=torch.float)).
        self.scale = jnp.array(scale, dtype=jnp.float32)
        # jit fuses the (free) wrapper reshapes around the pallas_call.
        self._fwd = jax.jit(scale_forward)

    def __call__(self, x):
        return self._fwd(x, self.scale)


if __name__ == "__main__":
    key = jax.random.PRNGKey(0)
    # Small NCHW input consistent with typical mmdet usage.
    x = jax.random.normal(key, (2, 4, 16, 16), dtype=jnp.float32)

    module = ScaleModule(scale=1.0)
    # Non-trivial scale value so the check is meaningful.
    module.scale = jnp.array(2.5, dtype=jnp.float32)

    y = module(x)
    y = jax.block_until_ready(y)

    ref = x * 2.5
    assert y.shape == x.shape and y.dtype == x.dtype
    assert jnp.allclose(y, ref, atol=1e-6, rtol=1e-6)
    print("KERNEL_OK")
</pallas_src>

<mosaic_0001>
module attributes {stable_mosaic.version = 11 : i64} {
  func.func @_scale_kernel(%arg0: i32, %arg1: memref<1x1xf32, #tpu.memory_space<smem>>, %arg2: memref<1x2048xf32, #tpu.memory_space<vmem>>, %arg3: memref<1x2048xf32, #tpu.memory_space<vmem>>) attributes {dimension_semantics = [#tpu.dimension_semantics<parallel>], iteration_bounds = array<i64: 1>, scalar_prefetch = 0 : i64, scratch_operands = 0 : i64, tpu.core_type = #tpu.core_type<tc>, window_params = [{transform_indices = @transform_0, window_bounds = array<i64: 1, 1>}, {transform_indices = @transform_1, window_bounds = array<i64: 1, 2048>}, {transform_indices = @transform_2, window_bounds = array<i64: 1, 2048>}]} {
    %c0 = arith.constant 0 : index
    %c0_0 = arith.constant 0 : index
    %0 = memref.load %arg1[%c0, %c0_0] : memref<1x1xf32, #tpu.memory_space<smem>>
    %c0_1 = arith.constant 0 : index
    %c0_2 = arith.constant 0 : index
    %1 = vector.load %arg2[%c0_1, %c0_2] : memref<1x2048xf32, #tpu.memory_space<vmem>>, vector<1x2048xf32>
    %2 = vector.broadcast %0 : f32 to vector<1x2048xf32>
    %3 = arith.mulf %1, %2 : vector<1x2048xf32>
    %c0_3 = arith.constant 0 : index
    %c0_4 = arith.constant 0 : index
    %4 = vector.load %arg3[%c0_3, %c0_4] : memref<1x2048xf32, #tpu.memory_space<vmem>>, vector<1x2048xf32>
    tpu.vector_store %arg3[%c0_3, %c0_4], %3 {strides = array<i32>} : memref<1x2048xf32, #tpu.memory_space<vmem>>, vector<1x2048xf32>,
    return
  }
  func.func @transform_0(%arg0: i32) -> (i32, i32) {
    %c0_i32 = arith.constant 0 : i32
    %c0_i32_0 = arith.constant 0 : i32
    %c0_i32_1 = arith.constant 0 : i32
    return %c0_i32, %c0_i32_0 : i32, i32
  }
  func.func @transform_1(%arg0: i32) -> (i32, i32) {
    %c0_i32 = arith.constant 0 : i32
    %c0_i32_0 = arith.constant 0 : i32
    return %arg0, %c0_i32 : i32, i32
  }
  func.func @transform_2(%arg0: i32) -> (i32, i32) {
    %c0_i32 = arith.constant 0 : i32
    %c0_i32_0 = arith.constant 0 : i32
    return %arg0, %c0_i32 : i32, i32
  }
}

</mosaic_0001>

<bundles_post_ra>
// kernel: scale_forward.1
= control target key start
LH: loop header
LB: loop body
LE: loop exit
PB: predicated region body
PF: predicated region fallthrough
CT: control target
= control target key end

     0   :  { %s54_s0 = inlined_call_operand.<no memory space> [shape: f32[1,1], index: 0, kind: input, shape index: {}]   ;;  %s55_s1 = inlined_call_operand.vmem [shape: f32[1,2048], index: 1, kind: input, shape index: {}]   ;;  %s56_s2 = inlined_call_operand.vmem [shape: f32[1,2048], index: 2, kind: output, shape index: {}]  }
   0x1   :  { %v13_v0 = vld [vmem:[%s55_s1] sm:$0xff]  ;;  %v15_v1 = vstv %s54_s0  ;;  %v14_v2 = vld [vmem:[%s55_s1 + $0x8] sm:$0xff] }
   0x2   :  { %v16_v3 = vmul.f32 %v15_v1, %v13_v0  ;;  %v17_v4 = vmul.f32 %v15_v1, %v14_v2 }
   0x4   :  { %18 = vst [vmem:[%s56_s2] sm:$0xff] %v16_v3  ;;  %19 = vst [vmem:[%s56_s2 + $0x8] sm:$0xff] %v17_v4 }

</bundles_post_ra>
